<compile_context>
chip_gen: v7x
topology: tpu7x:2x2x1
jax: 0.10.0
libtpu: 0.0.40
codegen_flags: <defaults>
</compile_context>

<pallas_src>
import functools

import jax
import jax.numpy as jnp
from jax import lax
from jax.experimental import pallas as pl
from jax.experimental.pallas import tpu as pltpu

# dot_general dimension numbers for A @ B^T (contract the last dim of both operands).
_NT_DIM_NUMBERS = (((1,), (1,)), ((), ()))


def _xavier_uniform(key, fan_out, fan_in, gain=1.0):
    # Matches torch.nn.init.xavier_uniform_ (gain=1) on a (out_features, in_features) weight.
    bound = gain * (6.0 / (fan_in + fan_out)) ** 0.5
    return jax.random.uniform(key, (fan_out, fan_in), dtype=jnp.float32,
                              minval=-bound, maxval=bound)


def init_params(key, num_inputs, num_outputs, hidden_dim):
    k1, k2, k3 = jax.random.split(key, 3)
    return {
        "w1": _xavier_uniform(k1, hidden_dim, num_inputs),   # (H, Din)  PyTorch Linear layout
        "b1": jnp.zeros((hidden_dim, 1), jnp.float32),
        "w2": _xavier_uniform(k2, hidden_dim, hidden_dim),   # (H, H)
        "b2": jnp.zeros((hidden_dim, 1), jnp.float32),
        "w3": _xavier_uniform(k3, num_outputs, hidden_dim),  # (Dout, H)
        "b3": jnp.zeros((num_outputs, 1), jnp.float32),
    }


def mi_net_kernel(x_ref, w1_ref, b1_ref, w2_ref, b2_ref, w3_ref, b3_ref, o_ref,
                  *, output_scale, output_bias, mxu_dtype):
    """Fused 3-layer MLP on one batch tile.

    x arrives in its natural (block_b, Din) layout; the first matmul contracts Din on
    both operands (A.B^T, MXU-native) so the activations come out transposed,
    (H, block_b), with the batch on the lane axis (lane-dense VPU/EUP work).  The
    result is transposed back in-kernel (tiny XLU op on Dout*block_b elements) and
    stored in the module's natural (block_b, Dout) layout.
    """
    x = x_ref[...].astype(mxu_dtype)                                       # (bb, Din)
    # h1^T = W1 @ x^T  -> (H, bb), f32 accumulation on the MXU.
    h1 = lax.dot_general(w1_ref[...], x, _NT_DIM_NUMBERS,
                         preferred_element_type=jnp.float32)
    h1 = jnp.maximum(h1 + b1_ref[...], 0.0)                                # (H, bb) f32
    h2 = jnp.dot(w2_ref[...], h1.astype(mxu_dtype),
                 preferred_element_type=jnp.float32)
    h2 = jnp.maximum(h2 + b2_ref[...], 0.0)                                # (H, bb) f32
    yT = jnp.dot(w3_ref[...], h2.astype(mxu_dtype),
                 preferred_element_type=jnp.float32)                       # (Dout, bb)
    oT = jnp.tanh(yT + b3_ref[...]) * output_scale + output_bias           # lane-dense
    # Small (Dout, bb) -> (bb, Dout) transpose; the masked 8-of-128-lane store is cheap
    # because the whole output is only B*Dout*4 bytes.
    o_ref[...] = jnp.transpose(oT, (1, 0))


def _vmem_limit_bytes():
    """Generation-aware VMEM budget: ~40 MiB on v7x (64 MiB/TC), 48 MiB on v5e/v6e."""
    try:
        cap = pltpu.get_tpu_info().vmem_capacity_bytes
    except Exception:
        cap = None
    if cap is None or cap <= (96 << 20):
        return 40 << 20
    return 48 << 20


def _choose_block_b(B, num_inputs, num_outputs, hidden, vmem_limit):
    """Largest batch tile (multiple of 128) whose per-step VMEM footprint fits the budget.

    Used with a pl.cdiv grid, so block_b need not divide B (the tail block is masked by
    Pallas).  For B >= 256 the tile is capped at ceil(B/2) so the grid has >= 2 steps
    and the "parallel" axis can split across the two v7x TensorCores.
    """
    if B <= 128:
        return B                                      # one full block (always legal)
    lane = 128
    rup = lambda n: -(-n // lane) * lane
    # Approx. f32 bytes live in VMEM per batch row per grid step.  Minor dims < 128 are
    # lane-padded inside VMEM windows (the (bb, Din)/(bb, Dout) buffers cost rup(.)
    # bytes per row) even though HBM traffic is only the logical bytes.
    per_row = 4 * (2 * rup(num_inputs)                # x window, double-buffered
                   + 3 * rup(num_outputs)             # out window (x2) + transposed result
                   + 3 * hidden                       # h1/h2 f32 + bf16 copies (lane-dense)
                   + num_inputs // 2)                 # bf16 copy of x
    budget = (vmem_limit * 5) // 8                    # headroom for weights + compiler scratch
    cap = min(32768, budget // per_row)
    if B >= 256:
        cap = min(cap, -(-B // 2))                    # grid >= 2 (v7x megacore)
    else:
        cap = min(cap, B)
    return max(128, (cap // 128) * 128)


def _const_spec(shape, single_buffer):
    index_map = lambda i: (0, 0)
    if single_buffer:
        # Weights/biases are resident (constant index_map): one VMEM buffer is enough.
        return pl.BlockSpec(shape, index_map, pipeline_mode=pl.Buffered(1))
    return pl.BlockSpec(shape, index_map)


def _forward(x, w1, b1, w2, b2, w3, b3, *, block_b, mxu_dtype, vmem_limit,
             single_buffer_weights):
    B, num_inputs = x.shape
    hidden = w1.shape[0]
    num_outputs = w3.shape[0]
    wbytes = jnp.dtype(mxu_dtype).itemsize

    kernel = functools.partial(mi_net_kernel, output_scale=0.5, output_bias=0.5,
                               mxu_dtype=mxu_dtype)

    flops = 2 * B * (num_inputs * hidden + hidden * hidden + hidden * num_outputs)
    bytes_accessed = (4 * B * (num_inputs + num_outputs)
                      + wbytes * (hidden * num_inputs + hidden * hidden
                                  + num_outputs * hidden)
                      + 4 * (2 * hidden + num_outputs))

    return pl.pallas_call(
        kernel,
        out_shape=jax.ShapeDtypeStruct((B, num_outputs), jnp.float32),
        grid_spec=pltpu.PrefetchScalarGridSpec(
            num_scalar_prefetch=0,
            grid=(pl.cdiv(B, block_b),),
            in_specs=[
                pl.BlockSpec((block_b, num_inputs), lambda i: (i, 0)),      # x (streamed)
                _const_spec((hidden, num_inputs), single_buffer_weights),   # W1 (resident)
                _const_spec((hidden, 1), single_buffer_weights),            # b1
                _const_spec((hidden, hidden), single_buffer_weights),       # W2
                _const_spec((hidden, 1), single_buffer_weights),            # b2
                _const_spec((num_outputs, hidden), single_buffer_weights),  # W3
                _const_spec((num_outputs, 1), single_buffer_weights),       # b3
            ],
            out_specs=pl.BlockSpec((block_b, num_outputs), lambda i: (i, 0)),
        ),
        compiler_params=pltpu.CompilerParams(
            dimension_semantics=("parallel",),
            vmem_limit_bytes=int(vmem_limit),
        ),
        cost_estimate=pl.CostEstimate(flops=flops, transcendentals=B * num_outputs,
                                      bytes_accessed=bytes_accessed),
    )(x, w1, b1, w2, b2, w3, b3)


def mutual_information_forward(state_action, params, *, block_b=None,
                               use_bf16_matmul=True):
    """Forward pass of MutualInformationNetwork as one fused Pallas kernel.

    state_action: (B, num_inputs) float32.  Returns (B, num_outputs) float32 in the
    module's natural layout (no wrapper-side transposes of x or the output).
    """
    B, num_inputs = state_action.shape
    hidden = params["w1"].shape[0]
    num_outputs = params["w3"].shape[0]
    mxu_dtype = jnp.bfloat16 if use_bf16_matmul else jnp.float32

    vmem_limit = _vmem_limit_bytes()
    if block_b is None:
        block_b = _choose_block_b(B, num_inputs, num_outputs, hidden, vmem_limit)

    args = (state_action,
            params["w1"].astype(mxu_dtype), params["b1"].astype(jnp.float32),
            params["w2"].astype(mxu_dtype), params["b2"].astype(jnp.float32),
            params["w3"].astype(mxu_dtype), params["b3"].astype(jnp.float32))
    kwargs = dict(block_b=block_b, mxu_dtype=mxu_dtype, vmem_limit=vmem_limit)
    try:
        return _forward(*args, single_buffer_weights=True, **kwargs)
    except Exception:
        # pipeline_mode=pl.Buffered(1) on the resident weight specs is not supported by
        # this JAX build; fall back to default double-buffered weights (a few KiB here).
        return _forward(*args, single_buffer_weights=False, **kwargs)


def reference_forward(state_action, params, *, use_bf16_matmul=True):
    # Pure-JAX reference mirroring the kernel's bf16-operand / f32-accumulate matmuls.
    mxu_dtype = jnp.bfloat16 if use_bf16_matmul else jnp.float32

    def lin(x, w, b):
        y = lax.dot_general(x.astype(mxu_dtype), w.astype(mxu_dtype),
                            _NT_DIM_NUMBERS, preferred_element_type=jnp.float32)
        return y + b.reshape(1, -1)

    h1 = jnp.maximum(lin(state_action, params["w1"], params["b1"]), 0.0)
    h2 = jnp.maximum(lin(h1, params["w2"], params["b2"]), 0.0)
    return jnp.tanh(lin(h2, params["w3"], params["b3"])) * 0.5 + 0.5


if __name__ == "__main__":
    key = jax.random.PRNGKey(0)
    kx, kp = jax.random.split(key)

    batch = 256          # -> block_b=128, grid=(2,): exercises streaming + megacore split
    num_inputs = 32      # e.g. state_dim + action_dim
    num_outputs = 8
    hidden_dim = 32

    state_action = jax.random.normal(kx, (batch, num_inputs), dtype=jnp.float32)
    params = init_params(kp, num_inputs, num_outputs, hidden_dim)

    out = jax.block_until_ready(mutual_information_forward(state_action, params))
    ref = reference_forward(state_action, params)
    assert out.shape == (batch, num_outputs)
    assert bool(jnp.allclose(out, ref, atol=2e-3, rtol=2e-3)), "mismatch vs reference"

    # Ragged batch: pl.cdiv grid with a masked tail block (block_b stays 128).
    ragged = jax.random.normal(jax.random.PRNGKey(1), (200, num_inputs), dtype=jnp.float32)
    out_r = jax.block_until_ready(mutual_information_forward(ragged, params))
    assert out_r.shape == (200, num_outputs)
    assert bool(jnp.allclose(out_r, reference_forward(ragged, params),
                             atol=2e-3, rtol=2e-3)), "ragged-batch mismatch"

    # Tiny batch: single full-extent block path.
    small = jax.random.normal(jax.random.PRNGKey(2), (8, num_inputs), dtype=jnp.float32)
    out_s = jax.block_until_ready(mutual_information_forward(small, params))
    assert bool(jnp.allclose(out_s, reference_forward(small, params),
                             atol=2e-3, rtol=2e-3)), "small-batch mismatch"

    print("KERNEL_OK")
</pallas_src>

<mosaic_0001>
module attributes {stable_mosaic.version = 11 : i64} {
  func.func @mi_net_kernel(%arg0: i32, %arg1: memref<128x32xf32, #tpu.memory_space<vmem>>, %arg2: memref<32x32xbf16, #tpu.memory_space<vmem>>, %arg3: memref<32x1xf32, #tpu.memory_space<vmem>>, %arg4: memref<32x32xbf16, #tpu.memory_space<vmem>>, %arg5: memref<32x1xf32, #tpu.memory_space<vmem>>, %arg6: memref<8x32xbf16, #tpu.memory_space<vmem>>, %arg7: memref<8x1xf32, #tpu.memory_space<vmem>>, %arg8: memref<128x8xf32, #tpu.memory_space<vmem>>) attributes {dimension_semantics = [#tpu.dimension_semantics<parallel>], iteration_bounds = array<i64: 2>, scalar_prefetch = 0 : i64, scratch_operands = 0 : i64, tpu.core_type = #tpu.core_type<tc>, window_params = [{transform_indices = @transform_0, window_bounds = array<i64: 128, 32>}, {pipeline_mode = #tpu.pipeline_mode<synchronous>, transform_indices = @transform_1, window_bounds = array<i64: 32, 32>}, {pipeline_mode = #tpu.pipeline_mode<synchronous>, transform_indices = @transform_2, window_bounds = array<i64: 32, 1>}, {pipeline_mode = #tpu.pipeline_mode<synchronous>, transform_indices = @transform_3, window_bounds = array<i64: 32, 32>}, {pipeline_mode = #tpu.pipeline_mode<synchronous>, transform_indices = @transform_4, window_bounds = array<i64: 32, 1>}, {pipeline_mode = #tpu.pipeline_mode<synchronous>, transform_indices = @transform_5, window_bounds = array<i64: 8, 32>}, {pipeline_mode = #tpu.pipeline_mode<synchronous>, transform_indices = @transform_6, window_bounds = array<i64: 8, 1>}, {transform_indices = @transform_7, window_bounds = array<i64: 128, 8>}]} {
    %c0 = arith.constant 0 : index
    %c0_0 = arith.constant 0 : index
    %0 = vector.load %arg1[%c0, %c0_0] : memref<128x32xf32, #tpu.memory_space<vmem>>, vector<128x32xf32>
    %1 = arith.truncf %0 : vector<128x32xf32> to vector<128x32xbf16>
    %c0_1 = arith.constant 0 : index
    %c0_2 = arith.constant 0 : index
    %2 = vector.load %arg2[%c0_1, %c0_2] : memref<32x32xbf16, #tpu.memory_space<vmem>>, vector<32x32xbf16>
    %cst = arith.constant dense<0.000000e+00> : vector<32x128xf32>
    %3 = tpu.matmul %2, %1, %cst {dimension_numbers = #tpu.dot_dimension_numbers<[1], [1], [0], [0], [0, 0, 1, 0], [], []>} : vector<32x32xbf16>, vector<128x32xbf16>, vector<32x128xf32> -> vector<32x128xf32>
    %c0_3 = arith.constant 0 : index
    %c0_4 = arith.constant 0 : index
    %4 = vector.load %arg3[%c0_3, %c0_4] : memref<32x1xf32, #tpu.memory_space<vmem>>, vector<32x1xf32>
    %5 = vector.broadcast %4 : vector<32x1xf32> to vector<32x128xf32>
    %6 = arith.addf %3, %5 : vector<32x128xf32>
    %cst_5 = arith.constant 0.000000e+00 : f32
    %7 = vector.broadcast %cst_5 : f32 to vector<32x128xf32>
    %8 = arith.maximumf %6, %7 : vector<32x128xf32>
    %c0_6 = arith.constant 0 : index
    %c0_7 = arith.constant 0 : index
    %9 = vector.load %arg4[%c0_6, %c0_7] : memref<32x32xbf16, #tpu.memory_space<vmem>>, vector<32x32xbf16>
    %10 = arith.truncf %8 : vector<32x128xf32> to vector<32x128xbf16>
    %cst_8 = arith.constant dense<0.000000e+00> : vector<32x128xf32>
    %11 = tpu.matmul %9, %10, %cst_8 {dimension_numbers = #tpu.dot_dimension_numbers<[1], [0], [0], [1], [0, 0, 1, 1], [], []>} : vector<32x32xbf16>, vector<32x128xbf16>, vector<32x128xf32> -> vector<32x128xf32>
    %c0_9 = arith.constant 0 : index
    %c0_10 = arith.constant 0 : index
    %12 = vector.load %arg5[%c0_9, %c0_10] : memref<32x1xf32, #tpu.memory_space<vmem>>, vector<32x1xf32>
    %13 = vector.broadcast %12 : vector<32x1xf32> to vector<32x128xf32>
    %14 = arith.addf %11, %13 : vector<32x128xf32>
    %cst_11 = arith.constant 0.000000e+00 : f32
    %15 = vector.broadcast %cst_11 : f32 to vector<32x128xf32>
    %16 = arith.maximumf %14, %15 : vector<32x128xf32>
    %c0_12 = arith.constant 0 : index
    %c0_13 = arith.constant 0 : index
    %17 = vector.load %arg6[%c0_12, %c0_13] : memref<8x32xbf16, #tpu.memory_space<vmem>>, vector<8x32xbf16>
    %18 = arith.truncf %16 : vector<32x128xf32> to vector<32x128xbf16>
    %cst_14 = arith.constant dense<0.000000e+00> : vector<8x128xf32>
    %19 = tpu.matmul %17, %18, %cst_14 {dimension_numbers = #tpu.dot_dimension_numbers<[1], [0], [0], [1], [0, 0, 1, 1], [], []>} : vector<8x32xbf16>, vector<32x128xbf16>, vector<8x128xf32> -> vector<8x128xf32>
    %c0_15 = arith.constant 0 : index
    %c0_16 = arith.constant 0 : index
    %20 = vector.load %arg7[%c0_15, %c0_16] : memref<8x1xf32, #tpu.memory_space<vmem>>, vector<8x1xf32>
    %21 = vector.broadcast %20 : vector<8x1xf32> to vector<8x128xf32>
    %22 = arith.addf %19, %21 : vector<8x128xf32>
    %23 = math.tanh %22 : vector<8x128xf32>
    %cst_17 = arith.constant 5.000000e-01 : f32
    %24 = vector.broadcast %cst_17 : f32 to vector<8x128xf32>
    %25 = arith.mulf %23, %24 : vector<8x128xf32>
    %cst_18 = arith.constant 5.000000e-01 : f32
    %26 = vector.broadcast %cst_18 : f32 to vector<8x128xf32>
    %27 = arith.addf %25, %26 : vector<8x128xf32>
    %28 = tpu.transpose %27, [1, 0] : vector<8x128xf32> -> vector<128x8xf32>
    %c0_19 = arith.constant 0 : index
    %c0_20 = arith.constant 0 : index
    %29 = vector.load %arg8[%c0_19, %c0_20] : memref<128x8xf32, #tpu.memory_space<vmem>>, vector<128x8xf32>
    tpu.vector_store %arg8[%c0_19, %c0_20], %28 {strides = array<i32>} : memref<128x8xf32, #tpu.memory_space<vmem>>, vector<128x8xf32>,
    return
  }
  func.func @transform_0(%arg0: i32) -> (i32, i32) {
    %c0_i32 = arith.constant 0 : i32
    %c0_i32_0 = arith.constant 0 : i32
    return %arg0, %c0_i32 : i32, i32
  }
  func.func @transform_1(%arg0: i32) -> (i32, i32) {
    %c0_i32 = arith.constant 0 : i32
    %c0_i32_0 = arith.constant 0 : i32
    %c0_i32_1 = arith.constant 0 : i32
    return %c0_i32, %c0_i32_0 : i32, i32
  }
  func.func @transform_2(%arg0: i32) -> (i32, i32) {
    %c0_i32 = arith.constant 0 : i32
    %c0_i32_0 = arith.constant 0 : i32
    %c0_i32_1 = arith.constant 0 : i32
    return %c0_i32, %c0_i32_0 : i32, i32
  }
  func.func @transform_3(%arg0: i32) -> (i32, i32) {
    %c0_i32 = arith.constant 0 : i32
    %c0_i32_0 = arith.constant 0 : i32
    %c0_i32_1 = arith.constant 0 : i32
    return %c0_i32, %c0_i32_0 : i32, i32
  }
  func.func @transform_4(%arg0: i32) -> (i32, i32) {
    %c0_i32 = arith.constant 0 : i32
    %c0_i32_0 = arith.constant 0 : i32
    %c0_i32_1 = arith.constant 0 : i32
    return %c0_i32, %c0_i32_0 : i32, i32
  }
  func.func @transform_5(%arg0: i32) -> (i32, i32) {
    %c0_i32 = arith.constant 0 : i32
    %c0_i32_0 = arith.constant 0 : i32
    %c0_i32_1 = arith.constant 0 : i32
    return %c0_i32, %c0_i32_0 : i32, i32
  }
  func.func @transform_6(%arg0: i32) -> (i32, i32) {
    %c0_i32 = arith.constant 0 : i32
    %c0_i32_0 = arith.constant 0 : i32
    %c0_i32_1 = arith.constant 0 : i32
    return %c0_i32, %c0_i32_0 : i32, i32
  }
  func.func @transform_7(%arg0: i32) -> (i32, i32) {
    %c0_i32 = arith.constant 0 : i32
    %c0_i32_0 = arith.constant 0 : i32
    return %arg0, %c0_i32 : i32, i32
  }
}

module attributes {stable_mosaic.version = 11 : i64} {
  func.func @mi_net_kernel(%arg0: i32, %arg1: memref<128x32xf32, #tpu.memory_space<vmem>>, %arg2: memref<32x32xbf16, #tpu.memory_space<vmem>>, %arg3: memref<32x1xf32, #tpu.memory_space<vmem>>, %arg4: memref<32x32xbf16, #tpu.memory_space<vmem>>, %arg5: memref<32x1xf32, #tpu.memory_space<vmem>>, %arg6: memref<8x32xbf16, #tpu.memory_space<vmem>>, %arg7: memref<8x1xf32, #tpu.memory_space<vmem>>, %arg8: memref<128x8xf32, #tpu.memory_space<vmem>>) attributes {dimension_semantics = [#tpu.dimension_semantics<parallel>], iteration_bounds = array<i64: 2>, scalar_prefetch = 0 : i64, scratch_operands = 0 : i64, tpu.core_type = #tpu.core_type<tc>, window_params = [{transform_indices = @transform_0, window_bounds = array<i64: 128, 32>}, {pipeline_mode = #tpu.pipeline_mode<synchronous>, transform_indices = @transform_1, window_bounds = array<i64: 32, 32>}, {pipeline_mode = #tpu.pipeline_mode<synchronous>, transform_indices = @transform_2, window_bounds = array<i64: 32, 1>}, {pipeline_mode = #tpu.pipeline_mode<synchronous>, transform_indices = @transform_3, window_bounds = array<i64: 32, 32>}, {pipeline_mode = #tpu.pipeline_mode<synchronous>, transform_indices = @transform_4, window_bounds = array<i64: 32, 1>}, {pipeline_mode = #tpu.pipeline_mode<synchronous>, transform_indices = @transform_5, window_bounds = array<i64: 8, 32>}, {pipeline_mode = #tpu.pipeline_mode<synchronous>, transform_indices = @transform_6, window_bounds = array<i64: 8, 1>}, {transform_indices = @transform_7, window_bounds = array<i64: 128, 8>}]} {
    %c0 = arith.constant 0 : index
    %c0_0 = arith.constant 0 : index
    %0 = vector.load %arg1[%c0, %c0_0] : memref<128x32xf32, #tpu.memory_space<vmem>>, vector<128x32xf32>
    %1 = arith.truncf %0 : vector<128x32xf32> to vector<128x32xbf16>
    %c0_1 = arith.constant 0 : index
    %c0_2 = arith.constant 0 : index
    %2 = vector.load %arg2[%c0_1, %c0_2] : memref<32x32xbf16, #tpu.memory_space<vmem>>, vector<32x32xbf16>
    %cst = arith.constant dense<0.000000e+00> : vector<32x128xf32>
    %3 = tpu.matmul %2, %1, %cst {dimension_numbers = #tpu.dot_dimension_numbers<[1], [1], [0], [0], [0, 0, 1, 0], [], []>} : vector<32x32xbf16>, vector<128x32xbf16>, vector<32x128xf32> -> vector<32x128xf32>
    %c0_3 = arith.constant 0 : index
    %c0_4 = arith.constant 0 : index
    %4 = vector.load %arg3[%c0_3, %c0_4] : memref<32x1xf32, #tpu.memory_space<vmem>>, vector<32x1xf32>
    %5 = vector.broadcast %4 : vector<32x1xf32> to vector<32x128xf32>
    %6 = arith.addf %3, %5 : vector<32x128xf32>
    %cst_5 = arith.constant 0.000000e+00 : f32
    %7 = vector.broadcast %cst_5 : f32 to vector<32x128xf32>
    %8 = arith.maximumf %6, %7 : vector<32x128xf32>
    %c0_6 = arith.constant 0 : index
    %c0_7 = arith.constant 0 : index
    %9 = vector.load %arg4[%c0_6, %c0_7] : memref<32x32xbf16, #tpu.memory_space<vmem>>, vector<32x32xbf16>
    %10 = arith.truncf %8 : vector<32x128xf32> to vector<32x128xbf16>
    %cst_8 = arith.constant dense<0.000000e+00> : vector<32x128xf32>
    %11 = tpu.matmul %9, %10, %cst_8 {dimension_numbers = #tpu.dot_dimension_numbers<[1], [0], [0], [1], [0, 0, 1, 1], [], []>} : vector<32x32xbf16>, vector<32x128xbf16>, vector<32x128xf32> -> vector<32x128xf32>
    %c0_9 = arith.constant 0 : index
    %c0_10 = arith.constant 0 : index
    %12 = vector.load %arg5[%c0_9, %c0_10] : memref<32x1xf32, #tpu.memory_space<vmem>>, vector<32x1xf32>
    %13 = vector.broadcast %12 : vector<32x1xf32> to vector<32x128xf32>
    %14 = arith.addf %11, %13 : vector<32x128xf32>
    %cst_11 = arith.constant 0.000000e+00 : f32
    %15 = vector.broadcast %cst_11 : f32 to vector<32x128xf32>
    %16 = arith.maximumf %14, %15 : vector<32x128xf32>
    %c0_12 = arith.constant 0 : index
    %c0_13 = arith.constant 0 : index
    %17 = vector.load %arg6[%c0_12, %c0_13] : memref<8x32xbf16, #tpu.memory_space<vmem>>, vector<8x32xbf16>
    %18 = arith.truncf %16 : vector<32x128xf32> to vector<32x128xbf16>
    %cst_14 = arith.constant dense<0.000000e+00> : vector<8x128xf32>
    %19 = tpu.matmul %17, %18, %cst_14 {dimension_numbers = #tpu.dot_dimension_numbers<[1], [0], [0], [1], [0, 0, 1, 1], [], []>} : vector<8x32xbf16>, vector<32x128xbf16>, vector<8x128xf32> -> vector<8x128xf32>
    %c0_15 = arith.constant 0 : index
    %c0_16 = arith.constant 0 : index
    %20 = vector.load %arg7[%c0_15, %c0_16] : memref<8x1xf32, #tpu.memory_space<vmem>>, vector<8x1xf32>
    %21 = vector.broadcast %20 : vector<8x1xf32> to vector<8x128xf32>
    %22 = arith.addf %19, %21 : vector<8x128xf32>
    %23 = math.tanh %22 : vector<8x128xf32>
    %cst_17 = arith.constant 5.000000e-01 : f32
    %24 = vector.broadcast %cst_17 : f32 to vector<8x128xf32>
    %25 = arith.mulf %23, %24 : vector<8x128xf32>
    %cst_18 = arith.constant 5.000000e-01 : f32
    %26 = vector.broadcast %cst_18 : f32 to vector<8x128xf32>
    %27 = arith.addf %25, %26 : vector<8x128xf32>
    %28 = tpu.transpose %27, [1, 0] : vector<8x128xf32> -> vector<128x8xf32>
    %c0_19 = arith.constant 0 : index
    %c0_20 = arith.constant 0 : index
    %29 = vector.load %arg8[%c0_19, %c0_20] : memref<128x8xf32, #tpu.memory_space<vmem>>, vector<128x8xf32>
    tpu.vector_store %arg8[%c0_19, %c0_20], %28 {strides = array<i32>} : memref<128x8xf32, #tpu.memory_space<vmem>>, vector<128x8xf32>,
    return
  }
  func.func @transform_0(%arg0: i32) -> (i32, i32) {
    %c0_i32 = arith.constant 0 : i32
    %c0_i32_0 = arith.constant 0 : i32
    return %arg0, %c0_i32 : i32, i32
  }
  func.func @transform_1(%arg0: i32) -> (i32, i32) {
    %c0_i32 = arith.constant 0 : i32
    %c0_i32_0 = arith.constant 0 : i32
    %c0_i32_1 = arith.constant 0 : i32
    return %c0_i32, %c0_i32_0 : i32, i32
  }
  func.func @transform_2(%arg0: i32) -> (i32, i32) {
    %c0_i32 = arith.constant 0 : i32
    %c0_i32_0 = arith.constant 0 : i32
    %c0_i32_1 = arith.constant 0 : i32
    return %c0_i32, %c0_i32_0 : i32, i32
  }
  func.func @transform_3(%arg0: i32) -> (i32, i32) {
    %c0_i32 = arith.constant 0 : i32
    %c0_i32_0 = arith.constant 0 : i32
    %c0_i32_1 = arith.constant 0 : i32
    return %c0_i32, %c0_i32_0 : i32, i32
  }
  func.func @transform_4(%arg0: i32) -> (i32, i32) {
    %c0_i32 = arith.constant 0 : i32
    %c0_i32_0 = arith.constant 0 : i32
    %c0_i32_1 = arith.constant 0 : i32
    return %c0_i32, %c0_i32_0 : i32, i32
  }
  func.func @transform_5(%arg0: i32) -> (i32, i32) {
    %c0_i32 = arith.constant 0 : i32
    %c0_i32_0 = arith.constant 0 : i32
    %c0_i32_1 = arith.constant 0 : i32
    return %c0_i32, %c0_i32_0 : i32, i32
  }
  func.func @transform_6(%arg0: i32) -> (i32, i32) {
    %c0_i32 = arith.constant 0 : i32
    %c0_i32_0 = arith.constant 0 : i32
    %c0_i32_1 = arith.constant 0 : i32
    return %c0_i32, %c0_i32_0 : i32, i32
  }
  func.func @transform_7(%arg0: i32) -> (i32, i32) {
    %c0_i32 = arith.constant 0 : i32
    %c0_i32_0 = arith.constant 0 : i32
    return %arg0, %c0_i32 : i32, i32
  }
}

</mosaic_0001>

<bundles_post_ra>
// kernel: tpu_custom_call.1
= control target key start
LH: loop header
LB: loop body
LE: loop exit
PB: predicated region body
PF: predicated region fallthrough
CT: control target
= control target key end

     0   :  { %s839_s24 = smov 0   ;;  %s978_s0 = inlined_call_operand.vmem [shape: f32[256,32], index: 0, kind: input, shape index: {}]   ;;  %s979_s1 = inlined_call_operand.vmem [shape: bf16[32,32], index: 1, kind: input, shape index: {}]   ;;  %s980_s2 = inlined_call_operand.vmem [shape: f32[32,1], index: 2, kind: input, shape index: {}]   ;;  %s981_s3 = inlined_call_operand.vmem [shape: bf16[32,32], index: 3, kind: input, shape index: {}]   ;;  %s982_s4 = inlined_call_operand.vmem [shape: f32[32,1], index: 4, kind: input, shape index: {}]   ;;  %s983_s5 = inlined_call_operand.vmem [shape: bf16[8,32], index: 5, kind: input, shape index: {}]   ;;  %s984_s6 = inlined_call_operand.vmem [shape: f32[8,1], index: 6, kind: input, shape index: {}]   ;;  %s985_s7 = inlined_call_operand.vmem [shape: f32[256,8], index: 7, kind: output, shape index: {}]  }
   0x1 LB: > { %s688_s25 = sadd.s32 4294967295, %s794_s24   ;;  %p692_p0 = scmp.ge.s32.totalorder %s794_s24, 1  ;;  %s794_s24 = sphi %s839_s24, %s17_s24  }
   0x2   : > { %p238_p1 = scmp.lt.s32.totalorder %s794_s24, 3 }
   0x4   : > { %p239_p2 = pnand %p692_p0, %p238_p1 }
   0x5   : > { %s693_s26 = sshll.u32 (!%p239_p2), %s688_s25, 4  ;;  %v782_v0 = vld [vmem:[%s979_s1] sm:$0xff] (!%p239_p2)   ;;  %vm345_vm0 = vcmask (!%p239_p2), 261120   ;;  %v796_v2 = vmov (!%p239_p2), 0   ;;  %v313_v3 = vld [vmem:[%s980_s2 + $0x10] sm:$0xff] (!%p239_p2)  ;;  %v312_v4 = vld [vmem:[%s980_s2 + $0x8] sm:$0xff] (!%p239_p2) }
   0x6   : > { %242 = sbr.rel (%p239_p2) target bundleno = 959 (0x3bf), region = 48  ;;  %p271_p3 = scmp.lt.s32.totalorder (!%p239_p2), %s693_s26, 31  ;;  %v311_v1 = vld [vmem:[%s980_s2] sm:$0xff] (!%p239_p2)  ;;  %741 = vmatprep.mubr.msk.bf16.mxu0 (!%p239_p2), %vm345_vm0, %v782_v0  ;;  %780 = vset.pattern.permute.xlu0 (!%p239_p2), %v796_v2  ;;  %v314_v5 = vld [vmem:[%s980_s2 + $0x18] sm:$0xff] (!%p239_p2)  ;;  %v436_v14 = vld [vmem:[%s982_s4 + $0x8] sm:$0xff] (!%p239_p2)  ;;  %v797_v0 = vmov (!%p239_p2), 0.0  }
   0x7   : > { %317 = vperm.xlu0 (!%p239_p2), %780, %v311_v1   ;;  %781 = vset.pattern.permute.xlu1 (!%p239_p2), %v796_v2  ;;  %v435_v12 = vld [vmem:[%s982_s4] sm:$0xff] (!%p239_p2)  ;;  %v437_v17 = vld [vmem:[%s982_s4 + $0x10] sm:$0xff] (!%p239_p2)  ;;  %v438_v18 = vld [vmem:[%s982_s4 + $0x18] sm:$0xff] (!%p239_p2)  ;;  %vm798_vm1 = vmmov (!%p239_p2), 0   ;;  %vm615_vm2 = vcmask (!%p239_p2), 64512  }
   0x8   : > { %327 = vperm.xlu1 (!%p239_p2), %781, %v313_v3   ;;  %v531_v21 = vld [vmem:[%s984_s6] sm:$0xff] (!%p239_p2)  ;;  %v783_v43 = vld [vmem:[%s979_s1 + $0x8] sm:$0xff] (!%p239_p2)  }
   0x9   : > { %v784_v44 = vld [vmem:[%s981_s3] sm:$0xff] (!%p239_p2)   ;;  %v785_v63 = vld [vmem:[%s981_s3 + $0x8] sm:$0xff] (!%p239_p2)  }
   0xa   : > { %749 = vmatprep.mubr.msk.bf16.mxu1 (!%p239_p2), %vm345_vm0, %v784_v44 }
   0xb   : > { %322 = vperm.xlu0 (!%p239_p2), %780, %v312_v4  }
   0xc   : > { %332 = vperm.xlu1 (!%p239_p2), %781, %v314_v5  }
   0xd   : > { %s987_s26 = smov (!%p271_p3, %s693_s26), 31 }
   0xe   : > { %s694_s10 = sshll.u32 %s987_s26, 3 }
   0xf   : > { %s868_s15 = scalar_lea.vmem %s978_s0, %s694_s10  ;;  %441 = vperm.xlu0 %780, %v435_v12   ;;  %s941_s18 = scalar_lea.vmem %s985_s7, %s694_s10 }
  0x10   : > { %v283_v6 = vld [vmem:[%s868_s15] sm:$0xff]  ;;  %v284_v7 = vld [vmem:[%s868_s15 + $0x8] sm:$0xff]  ;;  %v285_v8 = vld [vmem:[%s868_s15 + $0x10] sm:$0xff]  ;;  %446 = vperm.xlu1 %781, %v436_v14  }
  0x11   : > { %v299_v9 = vpack.c.bf16 %v284_v7, %v283_v6  ;;  %v286_v10 = vld [vmem:[%s868_s15 + $0x18] sm:$0xff]  ;;  %v287_v15 = vld [vmem:[%s868_s15 + $0x20] sm:$0xff]  ;;  %v288_v16 = vld [vmem:[%s868_s15 + $0x28] sm:$0xff] }
  0x12   : > { %v300_v11 = vpack.c.bf16 %v286_v10, %v285_v8  ;;  %v301_v20 = vpack.c.bf16 %v288_v16, %v287_v15  ;;  %v289_v22 = vld [vmem:[%s868_s15 + $0x30] sm:$0xff]  ;;  %v290_v23 = vld [vmem:[%s868_s15 + $0x38] sm:$0xff]  ;;  %v291_v26 = vld [vmem:[%s868_s15 + $0x40] sm:$0xff] }
  0x13   : > { %761 = vmatprep.subr.msk.bf16.mxu0 %vm345_vm0, %v299_v9  ;;  %v353_v13 = vsel %vm345_vm0, %v299_v9, 0  ;;  %451 = vperm.xlu0 %780, %v437_v17   ;;  %v302_v25 = vpack.c.bf16 %v290_v23, %v289_v22  ;;  %v292_v27 = vld [vmem:[%s868_s15 + $0x48] sm:$0xff]  ;;  %v293_v30 = vld [vmem:[%s868_s15 + $0x50] sm:$0xff]  ;;  %v294_v31 = vld [vmem:[%s868_s15 + $0x58] sm:$0xff] }
  0x14   : > { %726 = vmatpush3.bf16.xpose.msra.mxu0 %v353_v13  ;;  %v356_v19 = vsel %vm345_vm0, %v300_v11, 0  ;;  %456 = vperm.xlu1 %781, %v438_v18   ;;  %v359_v24 = vsel %vm345_vm0, %v301_v20, 0  ;;  %v303_v29 = vpack.c.bf16 %v292_v27, %v291_v26  ;;  %v304_v33 = vpack.c.bf16 %v294_v31, %v293_v30  ;;  %v295_v34 = vld [vmem:[%s868_s15 + $0x60] sm:$0xff]  ;;  %v296_v35 = vld [vmem:[%s868_s15 + $0x68] sm:$0xff]  ;;  %v297_v38 = vld [vmem:[%s868_s15 + $0x70] sm:$0xff] }
  0x15   : > { %762 = vmatprep.subr.msk.bf16.mxu0 %vm345_vm0, %v300_v11  ;;  %v362_v28 = vsel %vm345_vm0, %v302_v25, 0  ;;  %v305_v37 = vpack.c.bf16 %v296_v35, %v295_v34  ;;  %v298_v39 = vld [vmem:[%s868_s15 + $0x78] sm:$0xff] }
  0x16   : > { %v365_v32 = vsel %vm345_vm0, %v303_v29, 0  ;;  %v368_v36 = vsel %vm345_vm0, %v304_v33, 0  ;;  %v306_v41 = vpack.c.bf16 %v298_v39, %v297_v38 }
  0x17   : > { %534 = vperm.xlu0 %780, %v531_v21   ;;  %v371_v40 = vsel %vm345_vm0, %v305_v37, 0 }
  0x18   : > { %v374_v42 = vsel %vm345_vm0, %v306_v41, 0 }
  0x1c   : > { %728 = vmatpush3.bf16.xpose.msra.mxu0 %v356_v19  ;;  %v528_v19 = vld [vmem:[%s983_s5] sm:$0xf] }
  0x1d   : > { %763 = vmatprep.subr.msk.bf16.mxu0 %vm345_vm0, %v301_v20 }
  0x24   : > { %730 = vmatpush3.bf16.xpose.msra.mxu0 %v359_v24 }
  0x25   : > { %764 = vmatprep.subr.msk.bf16.mxu0 %vm345_vm0, %v302_v25 }
  0x2c   : > { %732 = vmatpush3.bf16.xpose.msra.mxu0 %v362_v28 }
  0x2d   : > { %765 = vmatprep.subr.msk.bf16.mxu0 %vm345_vm0, %v303_v29 }
  0x34   : > { %734 = vmatpush3.bf16.xpose.msra.mxu0 %v365_v32 }
  0x35   : > { %766 = vmatprep.subr.msk.bf16.mxu0 %vm345_vm0, %v304_v33 }
  0x3c   : > { %736 = vmatpush3.bf16.xpose.msra.mxu0 %v368_v36 }
  0x3d   : > { %767 = vmatprep.subr.msk.bf16.mxu0 %vm345_vm0, %v305_v37 }
  0x44   : > { %738 = vmatpush3.bf16.xpose.msra.mxu0 %v371_v40 }
  0x45   : > { %768 = vmatprep.subr.msk.bf16.mxu0 %vm345_vm0, %v306_v41 }
  0x4c   : > { %740 = vmatpush3.bf16.xpose.msra.mxu0 %v374_v42 }
  0x53   : > { %742 = vmatmul.mubr.msk.bf16.vlgmr.msra.gmra.mrb[0].mxu0 %vm345_vm0, %v783_v43 }
  0x86   : > { %v318_v46 = vpop.permute.xlu0 %317 }
  0x87   : > { %v328_v45 = vpop.permute.xlu1 %327 }
  0x8a   : > { %v323_v53 = vpop.permute.xlu0 %322 }
  0x8b   : > { %v333_v50 = vpop.permute.xlu1 %332 }
  0x8e   : > { %v442_v1 = vpop.permute.xlu0 %441 }
  0x8f   : > { %v447_v2 = vpop.permute.xlu1 %446 }
  0x92   : > { %v452_v3 = vpop.permute.xlu0 %451 }
  0x93   : > { %v457_v7 = vpop.permute.xlu1 %456 }
  0x96   : > { %v535_v20 = vpop.permute.xlu0 %534 }
 0x126   : > { %v743_v47 = vpop.f32.mrb[0].mxu0 }
 0x127   : > { %v419_v48 = vadd.f32 %v743_v47, %v328_v45  ;;  %v410_v49 = vpop.f32.mrb[1].mxu0 }
 0x128   : > { %v411_v51 = vadd.f32 %v410_v49, %v318_v46  ;;  %v744_v52 = vpop.f32.mrb[2].mxu0 }
 0x129   : > { %v422_v54 = vadd.f32 %v744_v52, %v333_v50  ;;  %v413_v55 = vpop.f32.mrb[3].mxu0  ;;  %v427_v57 = vmax.f32 %v419_v48, 0.0 }
 0x12a   : > { %v414_v56 = vadd.f32 %v413_v55, %v323_v53  ;;  %v425_v59 = vmax.f32 %v411_v51, 0.0 }
 0x12b   : > { %v428_v58 = vmax.f32 %v422_v54, 0.0 }
 0x12c   : > { %v426_v60 = vmax.f32 %v414_v56, 0.0 }
 0x12d   : > { %v434_v61 = vpack.c.bf16 %v428_v58, %v427_v57 }
 0x12e   : > { %v433_v62 = vpack.c.bf16 %v426_v60, %v425_v59 }
 0x130   : > { %745 = vmatprep.subr.bf16.mxu1 %v433_v62 }
 0x131   : > { %746 = vmatpush3.bf16.msra.mxu1 %v433_v62 }
 0x132   : > { %747 = vmatprep.subr.bf16.mxu1 %v434_v61 }
 0x135   : > { %748 = vmatpush3.bf16.msra.mxu1 %v434_v61 }
 0x136   : > { %753 = vmatprep.subr.bf16.mxu1 %v797_v0 }
 0x138   : > { %750 = vmatmul.mubr.msk.bf16.vlgmr.msra.gmra.mrb[0].mxu1 %vm345_vm0, %v785_v63 }
 0x139   : > { %757 = vmatprep.mubr.msk.bf16.mxu1 %vm798_vm1, %v797_v0 }
 0x20b   : > { %v751_v4 = vpop.f32.mrb[0].mxu1 }
 0x20c   : > { %v518_v5 = vadd.f32 %v751_v4, %v452_v3  ;;  %v509_v6 = vpop.f32.mrb[1].mxu1 }
 0x20d   : > { %v510_v8 = vadd.f32 %v509_v6, %v442_v1  ;;  %v752_v9 = vpop.f32.mrb[2].mxu1 }
 0x20e   : > { %v521_v10 = vadd.f32 %v752_v9, %v457_v7  ;;  %v512_v11 = vpop.f32.mrb[3].mxu1  ;;  %v526_v13 = vmax.f32 %v518_v5, 0.0 }
 0x20f   : > { %v513_v12 = vadd.f32 %v512_v11, %v447_v2  ;;  %v524_v15 = vmax.f32 %v510_v8, 0.0 }
 0x210   : > { %v527_v14 = vmax.f32 %v521_v10, 0.0 }
 0x211   : > { %v525_v16 = vmax.f32 %v513_v12, 0.0 }
 0x212   : > { %v530_v17 = vpack.c.bf16 %v527_v14, %v526_v13 }
 0x213   : > { %v529_v18 = vpack.c.bf16 %v525_v16, %v524_v15 }
 0x215   : > { %754 = vmatpush3.bf16.msra.mxu1 %v529_v18 }
 0x216   : > { %755 = vmatprep.subr.bf16.mxu1 %v797_v0 }
 0x219   : > { %756 = vmatpush3.bf16.msra.mxu1 %v530_v17 }
 0x21c   : > { %758 = vmatmul.mubr.msk.bf16.vlgmr.msra.gmra.mrb[4].mxu1 %vm345_vm0, %v528_v19 }
 0x2ef   : > { %v574_v21 = vpop.f32.mrb[4].mxu1 }
 0x2f0   : > { %v575_v22 = vadd.f32 %v574_v21, %v535_v20  ;;  %v759_v23 = vpop.f32.mrb[5].mxu1 }
 0x2f1   : > { %v577_v24 = vpop.f32.mrb[6].mxu1 }
 0x2f2   : > { %786 = vtanh.f32 %v575_v22  ;;  %v760_v25 = vpop.f32.mrb[7].mxu1 }
 0x2fc   : > { %v787_v26 = vpop.eup %786 }
 0x2fd   : > { %v581_v27 = vmul.f32 0.5, %v787_v26 }
 0x2ff   : > { %v582_v28 = vadd.f32 0.5, %v581_v27 }
 0x301   : > { %583 = vxpose.xlu1.b32.start.end [1/1] (short) %v582_v28, 128 }
 0x381   : > { %v599_v29 = vpop.trf.xlu1 }
 0x382   : > { %616 = vst.msk [vmem:[%s941_s18] sm:$0xff] %vm615_vm2, %v599_v29 }
 0x385   : > { %v600_v30 = vpop.trf.xlu1 }
 0x386   : > { %617 = vst.msk [vmem:[%s941_s18 + $0x8] sm:$0xff] %vm615_vm2, %v600_v30 }
 0x389   : > { %v601_v31 = vpop.trf.xlu1 }
 0x38a   : > { %618 = vst.msk [vmem:[%s941_s18 + $0x10] sm:$0xff] %vm615_vm2, %v601_v31 }
 0x38d   : > { %v602_v32 = vpop.trf.xlu1 }
 0x38e   : > { %619 = vst.msk [vmem:[%s941_s18 + $0x18] sm:$0xff] %vm615_vm2, %v602_v32 }
 0x391   : > { %v603_v33 = vpop.trf.xlu1 }
 0x392   : > { %620 = vst.msk [vmem:[%s941_s18 + $0x20] sm:$0xff] %vm615_vm2, %v603_v33 }
 0x395   : > { %v604_v34 = vpop.trf.xlu1 }
 0x396   : > { %621 = vst.msk [vmem:[%s941_s18 + $0x28] sm:$0xff] %vm615_vm2, %v604_v34 }
 0x399   : > { %v605_v35 = vpop.trf.xlu1 }
 0x39a   : > { %622 = vst.msk [vmem:[%s941_s18 + $0x30] sm:$0xff] %vm615_vm2, %v605_v35 }
 0x39d   : > { %v606_v36 = vpop.trf.xlu1 }
 0x39e   : > { %623 = vst.msk [vmem:[%s941_s18 + $0x38] sm:$0xff] %vm615_vm2, %v606_v36 }
 0x3a1   : > { %v607_v37 = vpop.trf.xlu1 }
 0x3a2   : > { %624 = vst.msk [vmem:[%s941_s18 + $0x40] sm:$0xff] %vm615_vm2, %v607_v37 }
 0x3a5   : > { %v608_v38 = vpop.trf.xlu1 }
 0x3a6   : > { %625 = vst.msk [vmem:[%s941_s18 + $0x48] sm:$0xff] %vm615_vm2, %v608_v38 }
 0x3a9   : > { %v609_v39 = vpop.trf.xlu1 }
 0x3aa   : > { %626 = vst.msk [vmem:[%s941_s18 + $0x50] sm:$0xff] %vm615_vm2, %v609_v39 }
 0x3ad   : > { %v610_v40 = vpop.trf.xlu1 }
 0x3ae   : > { %627 = vst.msk [vmem:[%s941_s18 + $0x58] sm:$0xff] %vm615_vm2, %v610_v40 }
 0x3b1   : > { %v611_v41 = vpop.trf.xlu1 }
 0x3b2   : > { %628 = vst.msk [vmem:[%s941_s18 + $0x60] sm:$0xff] %vm615_vm2, %v611_v41 }
 0x3b5   : > { %v612_v42 = vpop.trf.xlu1 }
 0x3b6   : > { %629 = vst.msk [vmem:[%s941_s18 + $0x68] sm:$0xff] %vm615_vm2, %v612_v42 }
 0x3b9   : > { %v613_v43 = vpop.trf.xlu1 }
 0x3ba   : > { %630 = vst.msk [vmem:[%s941_s18 + $0x70] sm:$0xff] %vm615_vm2, %v613_v43 }
 0x3bd   : > { %v614_v44 = vpop.trf.xlu1 }
 0x3be   : > { %631 = vst.msk [vmem:[%s941_s18 + $0x78] sm:$0xff] %vm615_vm2, %v614_v44 }
 0x3bf PF: > { %s17_s24 = sadd.s32 1, %s794_s24  }
 0x3c0   : > { %p14_p4 = scmp.ge.s32.totalorder %s17_s24, 4  }
 0x3c2   :  { %16 = sbr.rel (!%p14_p4) target bundleno = 1 (0x1), region = 78 }

// kernel: tpu_custom_call.1
= control target key start
LH: loop header
LB: loop body
LE: loop exit
PB: predicated region body
PF: predicated region fallthrough
CT: control target
= control target key end

     0   :  { %s839_s24 = smov 0   ;;  %s978_s0 = inlined_call_operand.vmem [shape: f32[256,32], index: 0, kind: input, shape index: {}]   ;;  %s979_s1 = inlined_call_operand.vmem [shape: bf16[32,32], index: 1, kind: input, shape index: {}]   ;;  %s980_s2 = inlined_call_operand.vmem [shape: f32[32,1], index: 2, kind: input, shape index: {}]   ;;  %s981_s3 = inlined_call_operand.vmem [shape: bf16[32,32], index: 3, kind: input, shape index: {}]   ;;  %s982_s4 = inlined_call_operand.vmem [shape: f32[32,1], index: 4, kind: input, shape index: {}]   ;;  %s983_s5 = inlined_call_operand.vmem [shape: bf16[8,32], index: 5, kind: input, shape index: {}]   ;;  %s984_s6 = inlined_call_operand.vmem [shape: f32[8,1], index: 6, kind: input, shape index: {}]   ;;  %s985_s7 = inlined_call_operand.vmem [shape: f32[256,8], index: 7, kind: output, shape index: {}]  }
   0x1 LB: > { %s688_s25 = sadd.s32 4294967295, %s794_s24   ;;  %p692_p0 = scmp.ge.s32.totalorder %s794_s24, 1  ;;  %s794_s24 = sphi %s839_s24, %s17_s24  }
   0x2   : > { %p238_p1 = scmp.lt.s32.totalorder %s794_s24, 3 }
   0x4   : > { %p239_p2 = pnand %p692_p0, %p238_p1 }
   0x5   : > { %s693_s26 = sshll.u32 (!%p239_p2), %s688_s25, 4  ;;  %v782_v0 = vld [vmem:[%s979_s1] sm:$0xff] (!%p239_p2)   ;;  %vm345_vm0 = vcmask (!%p239_p2), 261120   ;;  %v796_v2 = vmov (!%p239_p2), 0   ;;  %v313_v3 = vld [vmem:[%s980_s2 + $0x10] sm:$0xff] (!%p239_p2)  ;;  %v312_v4 = vld [vmem:[%s980_s2 + $0x8] sm:$0xff] (!%p239_p2) }
   0x6   : > { %242 = sbr.rel (%p239_p2) target bundleno = 959 (0x3bf), region = 48  ;;  %p271_p3 = scmp.lt.s32.totalorder (!%p239_p2), %s693_s26, 31  ;;  %v311_v1 = vld [vmem:[%s980_s2] sm:$0xff] (!%p239_p2)  ;;  %741 = vmatprep.mubr.msk.bf16.mxu0 (!%p239_p2), %vm345_vm0, %v782_v0  ;;  %780 = vset.pattern.permute.xlu0 (!%p239_p2), %v796_v2  ;;  %v314_v5 = vld [vmem:[%s980_s2 + $0x18] sm:$0xff] (!%p239_p2)  ;;  %v436_v14 = vld [vmem:[%s982_s4 + $0x8] sm:$0xff] (!%p239_p2)  ;;  %v797_v0 = vmov (!%p239_p2), 0.0  }
   0x7   : > { %317 = vperm.xlu0 (!%p239_p2), %780, %v311_v1   ;;  %781 = vset.pattern.permute.xlu1 (!%p239_p2), %v796_v2  ;;  %v435_v12 = vld [vmem:[%s982_s4] sm:$0xff] (!%p239_p2)  ;;  %v437_v17 = vld [vmem:[%s982_s4 + $0x10] sm:$0xff] (!%p239_p2)  ;;  %v438_v18 = vld [vmem:[%s982_s4 + $0x18] sm:$0xff] (!%p239_p2)  ;;  %vm798_vm1 = vmmov (!%p239_p2), 0   ;;  %vm615_vm2 = vcmask (!%p239_p2), 64512  }
   0x8   : > { %327 = vperm.xlu1 (!%p239_p2), %781, %v313_v3   ;;  %v531_v21 = vld [vmem:[%s984_s6] sm:$0xff] (!%p239_p2)  ;;  %v783_v43 = vld [vmem:[%s979_s1 + $0x8] sm:$0xff] (!%p239_p2)  }
   0x9   : > { %v784_v44 = vld [vmem:[%s981_s3] sm:$0xff] (!%p239_p2)   ;;  %v785_v63 = vld [vmem:[%s981_s3 + $0x8] sm:$0xff] (!%p239_p2)  }
   0xa   : > { %749 = vmatprep.mubr.msk.bf16.mxu1 (!%p239_p2), %vm345_vm0, %v784_v44 }
   0xb   : > { %322 = vperm.xlu0 (!%p239_p2), %780, %v312_v4  }
   0xc   : > { %332 = vperm.xlu1 (!%p239_p2), %781, %v314_v5  }
   0xd   : > { %s987_s26 = smov (!%p271_p3, %s693_s26), 31 }
   0xe   : > { %s694_s10 = sshll.u32 %s987_s26, 3 }
   0xf   : > { %s868_s15 = scalar_lea.vmem %s978_s0, %s694_s10  ;;  %441 = vperm.xlu0 %780, %v435_v12   ;;  %s941_s18 = scalar_lea.vmem %s985_s7, %s694_s10 }
  0x10   : > { %v283_v6 = vld [vmem:[%s868_s15] sm:$0xff]  ;;  %v284_v7 = vld [vmem:[%s868_s15 + $0x8] sm:$0xff]  ;;  %v285_v8 = vld [vmem:[%s868_s15 + $0x10] sm:$0xff]  ;;  %446 = vperm.xlu1 %781, %v436_v14  }
  0x11   : > { %v299_v9 = vpack.c.bf16 %v284_v7, %v283_v6  ;;  %v286_v10 = vld [vmem:[%s868_s15 + $0x18] sm:$0xff]  ;;  %v287_v15 = vld [vmem:[%s868_s15 + $0x20] sm:$0xff]  ;;  %v288_v16 = vld [vmem:[%s868_s15 + $0x28] sm:$0xff] }
  0x12   : > { %v300_v11 = vpack.c.bf16 %v286_v10, %v285_v8  ;;  %v301_v20 = vpack.c.bf16 %v288_v16, %v287_v15  ;;  %v289_v22 = vld [vmem:[%s868_s15 + $0x30] sm:$0xff]  ;;  %v290_v23 = vld [vmem:[%s868_s15 + $0x38] sm:$0xff]  ;;  %v291_v26 = vld [vmem:[%s868_s15 + $0x40] sm:$0xff] }
  0x13   : > { %761 = vmatprep.subr.msk.bf16.mxu0 %vm345_vm0, %v299_v9  ;;  %v353_v13 = vsel %vm345_vm0, %v299_v9, 0  ;;  %451 = vperm.xlu0 %780, %v437_v17   ;;  %v302_v25 = vpack.c.bf16 %v290_v23, %v289_v22  ;;  %v292_v27 = vld [vmem:[%s868_s15 + $0x48] sm:$0xff]  ;;  %v293_v30 = vld [vmem:[%s868_s15 + $0x50] sm:$0xff]  ;;  %v294_v31 = vld [vmem:[%s868_s15 + $0x58] sm:$0xff] }
  0x14   : > { %726 = vmatpush3.bf16.xpose.msra.mxu0 %v353_v13  ;;  %v356_v19 = vsel %vm345_vm0, %v300_v11, 0  ;;  %456 = vperm.xlu1 %781, %v438_v18   ;;  %v359_v24 = vsel %vm345_vm0, %v301_v20, 0  ;;  %v303_v29 = vpack.c.bf16 %v292_v27, %v291_v26  ;;  %v304_v33 = vpack.c.bf16 %v294_v31, %v293_v30  ;;  %v295_v34 = vld [vmem:[%s868_s15 + $0x60] sm:$0xff]  ;;  %v296_v35 = vld [vmem:[%s868_s15 + $0x68] sm:$0xff]  ;;  %v297_v38 = vld [vmem:[%s868_s15 + $0x70] sm:$0xff] }
  0x15   : > { %762 = vmatprep.subr.msk.bf16.mxu0 %vm345_vm0, %v300_v11  ;;  %v362_v28 = vsel %vm345_vm0, %v302_v25, 0  ;;  %v305_v37 = vpack.c.bf16 %v296_v35, %v295_v34  ;;  %v298_v39 = vld [vmem:[%s868_s15 + $0x78] sm:$0xff] }
  0x16   : > { %v365_v32 = vsel %vm345_vm0, %v303_v29, 0  ;;  %v368_v36 = vsel %vm345_vm0, %v304_v33, 0  ;;  %v306_v41 = vpack.c.bf16 %v298_v39, %v297_v38 }
  0x17   : > { %534 = vperm.xlu0 %780, %v531_v21   ;;  %v371_v40 = vsel %vm345_vm0, %v305_v37, 0 }
  0x18   : > { %v374_v42 = vsel %vm345_vm0, %v306_v41, 0 }
  0x1c   : > { %728 = vmatpush3.bf16.xpose.msra.mxu0 %v356_v19  ;;  %v528_v19 = vld [vmem:[%s983_s5] sm:$0xf] }
  0x1d   : > { %763 = vmatprep.subr.msk.bf16.mxu0 %vm345_vm0, %v301_v20 }
  0x24   : > { %730 = vmatpush3.bf16.xpose.msra.mxu0 %v359_v24 }
  0x25   : > { %764 = vmatprep.subr.msk.bf16.mxu0 %vm345_vm0, %v302_v25 }
  0x2c   : > { %732 = vmatpush3.bf16.xpose.msra.mxu0 %v362_v28 }
  0x2d   : > { %765 = vmatprep.subr.msk.bf16.mxu0 %vm345_vm0, %v303_v29 }
  0x34   : > { %734 = vmatpush3.bf16.xpose.msra.mxu0 %v365_v32 }
  0x35   : > { %766 = vmatprep.subr.msk.bf16.mxu0 %vm345_vm0, %v304_v33 }
  0x3c   : > { %736 = vmatpush3.bf16.xpose.msra.mxu0 %v368_v36 }
  0x3d   : > { %767 = vmatprep.subr.msk.bf16.mxu0 %vm345_vm0, %v305_v37 }
  0x44   : > { %738 = vmatpush3.bf16.xpose.msra.mxu0 %v371_v40 }
  0x45   : > { %768 = vmatprep.subr.msk.bf16.mxu0 %vm345_vm0, %v306_v41 }
  0x4c   : > { %740 = vmatpush3.bf16.xpose.msra.mxu0 %v374_v42 }
  0x53   : > { %742 = vmatmul.mubr.msk.bf16.vlgmr.msra.gmra.mrb[0].mxu0 %vm345_vm0, %v783_v43 }
  0x86   : > { %v318_v46 = vpop.permute.xlu0 %317 }
  0x87   : > { %v328_v45 = vpop.permute.xlu1 %327 }
  0x8a   : > { %v323_v53 = vpop.permute.xlu0 %322 }
  0x8b   : > { %v333_v50 = vpop.permute.xlu1 %332 }
  0x8e   : > { %v442_v1 = vpop.permute.xlu0 %441 }
  0x8f   : > { %v447_v2 = vpop.permute.xlu1 %446 }
  0x92   : > { %v452_v3 = vpop.permute.xlu0 %451 }
  0x93   : > { %v457_v7 = vpop.permute.xlu1 %456 }
  0x96   : > { %v535_v20 = vpop.permute.xlu0 %534 }
 0x126   : > { %v743_v47 = vpop.f32.mrb[0].mxu0 }
 0x127   : > { %v419_v48 = vadd.f32 %v743_v47, %v328_v45  ;;  %v410_v49 = vpop.f32.mrb[1].mxu0 }
 0x128   : > { %v411_v51 = vadd.f32 %v410_v49, %v318_v46  ;;  %v744_v52 = vpop.f32.mrb[2].mxu0 }
 0x129   : > { %v422_v54 = vadd.f32 %v744_v52, %v333_v50  ;;  %v413_v55 = vpop.f32.mrb[3].mxu0  ;;  %v427_v57 = vmax.f32 %v419_v48, 0.0 }
 0x12a   : > { %v414_v56 = vadd.f32 %v413_v55, %v323_v53  ;;  %v425_v59 = vmax.f32 %v411_v51, 0.0 }
 0x12b   : > { %v428_v58 = vmax.f32 %v422_v54, 0.0 }
 0x12c   : > { %v426_v60 = vmax.f32 %v414_v56, 0.0 }
 0x12d   : > { %v434_v61 = vpack.c.bf16 %v428_v58, %v427_v57 }
 0x12e   : > { %v433_v62 = vpack.c.bf16 %v426_v60, %v425_v59 }
 0x130   : > { %745 = vmatprep.subr.bf16.mxu1 %v433_v62 }
 0x131   : > { %746 = vmatpush3.bf16.msra.mxu1 %v433_v62 }
 0x132   : > { %747 = vmatprep.subr.bf16.mxu1 %v434_v61 }
 0x135   : > { %748 = vmatpush3.bf16.msra.mxu1 %v434_v61 }
 0x136   : > { %753 = vmatprep.subr.bf16.mxu1 %v797_v0 }
 0x138   : > { %750 = vmatmul.mubr.msk.bf16.vlgmr.msra.gmra.mrb[0].mxu1 %vm345_vm0, %v785_v63 }
 0x139   : > { %757 = vmatprep.mubr.msk.bf16.mxu1 %vm798_vm1, %v797_v0 }
 0x20b   : > { %v751_v4 = vpop.f32.mrb[0].mxu1 }
 0x20c   : > { %v518_v5 = vadd.f32 %v751_v4, %v452_v3  ;;  %v509_v6 = vpop.f32.mrb[1].mxu1 }
 0x20d   : > { %v510_v8 = vadd.f32 %v509_v6, %v442_v1  ;;  %v752_v9 = vpop.f32.mrb[2].mxu1 }
 0x20e   : > { %v521_v10 = vadd.f32 %v752_v9, %v457_v7  ;;  %v512_v11 = vpop.f32.mrb[3].mxu1  ;;  %v526_v13 = vmax.f32 %v518_v5, 0.0 }
 0x20f   : > { %v513_v12 = vadd.f32 %v512_v11, %v447_v2  ;;  %v524_v15 = vmax.f32 %v510_v8, 0.0 }
 0x210   : > { %v527_v14 = vmax.f32 %v521_v10, 0.0 }
 0x211   : > { %v525_v16 = vmax.f32 %v513_v12, 0.0 }
 0x212   : > { %v530_v17 = vpack.c.bf16 %v527_v14, %v526_v13 }
 0x213   : > { %v529_v18 = vpack.c.bf16 %v525_v16, %v524_v15 }
 0x215   : > { %754 = vmatpush3.bf16.msra.mxu1 %v529_v18 }
 0x216   : > { %755 = vmatprep.subr.bf16.mxu1 %v797_v0 }
 0x219   : > { %756 = vmatpush3.bf16.msra.mxu1 %v530_v17 }
 0x21c   : > { %758 = vmatmul.mubr.msk.bf16.vlgmr.msra.gmra.mrb[4].mxu1 %vm345_vm0, %v528_v19 }
 0x2ef   : > { %v574_v21 = vpop.f32.mrb[4].mxu1 }
 0x2f0   : > { %v575_v22 = vadd.f32 %v574_v21, %v535_v20  ;;  %v759_v23 = vpop.f32.mrb[5].mxu1 }
 0x2f1   : > { %v577_v24 = vpop.f32.mrb[6].mxu1 }
 0x2f2   : > { %786 = vtanh.f32 %v575_v22  ;;  %v760_v25 = vpop.f32.mrb[7].mxu1 }
 0x2fc   : > { %v787_v26 = vpop.eup %786 }
 0x2fd   : > { %v581_v27 = vmul.f32 0.5, %v787_v26 }
 0x2ff   : > { %v582_v28 = vadd.f32 0.5, %v581_v27 }
 0x301   : > { %583 = vxpose.xlu1.b32.start.end [1/1] (short) %v582_v28, 128 }
 0x381   : > { %v599_v29 = vpop.trf.xlu1 }
 0x382   : > { %616 = vst.msk [vmem:[%s941_s18] sm:$0xff] %vm615_vm2, %v599_v29 }
 0x385   : > { %v600_v30 = vpop.trf.xlu1 }
 0x386   : > { %617 = vst.msk [vmem:[%s941_s18 + $0x8] sm:$0xff] %vm615_vm2, %v600_v30 }
 0x389   : > { %v601_v31 = vpop.trf.xlu1 }
 0x38a   : > { %618 = vst.msk [vmem:[%s941_s18 + $0x10] sm:$0xff] %vm615_vm2, %v601_v31 }
 0x38d   : > { %v602_v32 = vpop.trf.xlu1 }
 0x38e   : > { %619 = vst.msk [vmem:[%s941_s18 + $0x18] sm:$0xff] %vm615_vm2, %v602_v32 }
 0x391   : > { %v603_v33 = vpop.trf.xlu1 }
 0x392   : > { %620 = vst.msk [vmem:[%s941_s18 + $0x20] sm:$0xff] %vm615_vm2, %v603_v33 }
 0x395   : > { %v604_v34 = vpop.trf.xlu1 }
 0x396   : > { %621 = vst.msk [vmem:[%s941_s18 + $0x28] sm:$0xff] %vm615_vm2, %v604_v34 }
 0x399   : > { %v605_v35 = vpop.trf.xlu1 }
 0x39a   : > { %622 = vst.msk [vmem:[%s941_s18 + $0x30] sm:$0xff] %vm615_vm2, %v605_v35 }
 0x39d   : > { %v606_v36 = vpop.trf.xlu1 }
 0x39e   : > { %623 = vst.msk [vmem:[%s941_s18 + $0x38] sm:$0xff] %vm615_vm2, %v606_v36 }
 0x3a1   : > { %v607_v37 = vpop.trf.xlu1 }
 0x3a2   : > { %624 = vst.msk [vmem:[%s941_s18 + $0x40] sm:$0xff] %vm615_vm2, %v607_v37 }
 0x3a5   : > { %v608_v38 = vpop.trf.xlu1 }
 0x3a6   : > { %625 = vst.msk [vmem:[%s941_s18 + $0x48] sm:$0xff] %vm615_vm2, %v608_v38 }
 0x3a9   : > { %v609_v39 = vpop.trf.xlu1 }
 0x3aa   : > { %626 = vst.msk [vmem:[%s941_s18 + $0x50] sm:$0xff] %vm615_vm2, %v609_v39 }
 0x3ad   : > { %v610_v40 = vpop.trf.xlu1 }
 0x3ae   : > { %627 = vst.msk [vmem:[%s941_s18 + $0x58] sm:$0xff] %vm615_vm2, %v610_v40 }
 0x3b1   : > { %v611_v41 = vpop.trf.xlu1 }
 0x3b2   : > { %628 = vst.msk [vmem:[%s941_s18 + $0x60] sm:$0xff] %vm615_vm2, %v611_v41 }
 0x3b5   : > { %v612_v42 = vpop.trf.xlu1 }
 0x3b6   : > { %629 = vst.msk [vmem:[%s941_s18 + $0x68] sm:$0xff] %vm615_vm2, %v612_v42 }
 0x3b9   : > { %v613_v43 = vpop.trf.xlu1 }
 0x3ba   : > { %630 = vst.msk [vmem:[%s941_s18 + $0x70] sm:$0xff] %vm615_vm2, %v613_v43 }
 0x3bd   : > { %v614_v44 = vpop.trf.xlu1 }
 0x3be   : > { %631 = vst.msk [vmem:[%s941_s18 + $0x78] sm:$0xff] %vm615_vm2, %v614_v44 }
 0x3bf PF: > { %s17_s24 = sadd.s32 1, %s794_s24  }
 0x3c0   : > { %p14_p4 = scmp.ge.s32.totalorder %s17_s24, 4  }
 0x3c2   :  { %16 = sbr.rel (!%p14_p4) target bundleno = 1 (0x1), region = 78 }

</bundles_post_ra>
